<compile_context>
chip_gen: v5e
topology: v5e:2x2
jax: 0.10.0
libtpu: 0.0.40
codegen_flags: <defaults>
</compile_context>

<pallas_src>
import jax
import jax.numpy as jnp
from jax.experimental import pallas as pl
from jax.experimental.pallas import tpu as pltpu


_SMALL_C_MAX = 32                        # <= this -> rows-in-lanes (transposed) layout
_TILE_WORKSET_BUDGET = 12 * 1024 * 1024  # per-tile working-set target
_VMEM_LIMIT_BYTES = 32 * 1024 * 1024     # safe on v5e / v6e / v7x


def _round_up(x: int, m: int) -> int:
    return (x + m - 1) // m * m


def _focal_term(pt, gamma: float):
    """(1 - pt)^gamma.  Integer gamma is unrolled into multiplies (keeps extra
    transcendentals off the hot path / v5e's single EUP); otherwise
    exp(gamma*log(.)) with a guard at pt >= 1."""
    one_minus = 1.0 - pt
    if float(gamma).is_integer() and 0 <= int(gamma) <= 8:
        focal = jnp.ones_like(one_minus)
        for _ in range(int(gamma)):
            focal = focal * one_minus
        return focal
    # TODO(synk): PyTorch pow gives NaN for a slightly negative base; we clamp to 0.
    return jnp.where(
        one_minus > 0.0,
        jnp.exp(float(gamma) * jnp.log(jnp.maximum(one_minus, 1e-38))),
        0.0,
    )


def _partial_to_block(s):
    """Pack a (1,1) partial sum into a full (1,8,128) zero block (sublane 0,
    lane 0) so the per-tile output store is a full-width, tile-aligned write."""
    sub = jax.lax.broadcasted_iota(jnp.int32, (8, 128), 0)
    lane = jax.lax.broadcasted_iota(jnp.int32, (8, 128), 1)
    blk = jnp.where((sub == 0) & (lane == 0), s, 0.0)
    return blk.reshape(1, 8, 128)


def _make_kernel_rows_in_lanes(gamma, num_classes, tile_cols, num_valid,
                               need_mask, has_alpha):
    """Small-C layout: logits block (C, TN) -- classes in sublanes, rows in lanes."""

    def kernel(*refs):
        if has_alpha:
            x_ref, t_ref, a_ref, out_ref = refs
        else:
            x_ref, t_ref, out_ref = refs

        x = x_ref[...].astype(jnp.float32)            # (C, TN)
        t = t_ref[...]                                # (1, TN) int32

        cls = jax.lax.broadcasted_iota(jnp.int32, (num_classes, tile_cols), 0)
        onehot = cls == t                             # (C, TN)

        # Stable log-softmax over the (short) class / sublane axis.
        m = jnp.max(x, axis=0, keepdims=True)                               # (1, TN)
        lse = m + jnp.log(jnp.sum(jnp.exp(x - m), axis=0, keepdims=True))   # (1, TN)
        x_t = jnp.sum(jnp.where(onehot, x, 0.0), axis=0, keepdims=True)     # (1, TN)
        logpt = x_t - lse
        pt = jnp.exp(logpt)

        weighted = logpt
        if has_alpha:
            weighted = weighted * a_ref[...]          # per-row alpha (wrapper gather)
        loss = -_focal_term(pt, gamma) * weighted     # (1, TN)

        if need_mask:                                 # only traced for ragged grids
            col = (pl.program_id(0) * tile_cols
                   + jax.lax.broadcasted_iota(jnp.int32, (1, tile_cols), 1))
            loss = jnp.where(col < num_valid, loss, 0.0)

        out_ref[...] = _partial_to_block(jnp.sum(loss, axis=1, keepdims=True))

    return kernel


def _make_kernel_rows_in_sublanes(gamma, num_classes, tile_rows, num_valid,
                                  need_mask, has_alpha):
    """Large-C layout: logits block (TB, C) -- rows in sublanes, classes in lanes."""

    def kernel(*refs):
        if has_alpha:
            x_ref, t_ref, a_ref, out_ref = refs
        else:
            x_ref, t_ref, out_ref = refs

        x = x_ref[...].astype(jnp.float32)            # (TB, C)
        t = t_ref[...]                                # (TB, 1) int32

        col = jax.lax.broadcasted_iota(jnp.int32, (tile_rows, num_classes), 1)
        onehot = col == t                             # (TB, C)

        m = jnp.max(x, axis=1, keepdims=True)                               # (TB, 1)
        lse = m + jnp.log(jnp.sum(jnp.exp(x - m), axis=1, keepdims=True))
        x_t = jnp.sum(jnp.where(onehot, x, 0.0), axis=1, keepdims=True)
        logpt = x_t - lse
        pt = jnp.exp(logpt)

        weighted = logpt
        if has_alpha:
            weighted = weighted * a_ref[...]
        loss = -_focal_term(pt, gamma) * weighted     # (TB, 1)

        if need_mask:
            row = (pl.program_id(0) * tile_rows
                   + jax.lax.broadcasted_iota(jnp.int32, (tile_rows, 1), 0))
            loss = jnp.where(row < num_valid, loss, 0.0)

        out_ref[...] = _partial_to_block(jnp.sum(loss, axis=0, keepdims=True))

    return kernel


def _alpha_vector(alpha):
    if alpha is None:
        return None
    if isinstance(alpha, (float, int)) and not isinstance(alpha, bool):
        return jnp.asarray([float(alpha), 1.0 - float(alpha)], jnp.float32)
    return jnp.asarray(alpha, jnp.float32).reshape(-1)


def focal_loss(inputs, target, *, gamma=2.0, alpha=None, size_average=True):
    """Pallas TPU implementation of FocalLoss.forward."""
    # --- flatten exactly like the module (class dim last); dtype is preserved ---
    num_classes = inputs.shape[1]
    if inputs.ndim > 2:
        x3 = inputs.reshape(inputs.shape[0], num_classes, -1)   # (B, C, D)
        n_rows = x3.shape[0] * x3.shape[2]
    else:
        x3 = None
        n_rows = inputs.shape[0]
    C, N = num_classes, n_rows

    t_flat = target.reshape(-1).astype(jnp.int32)

    # alpha handling mirrors the module: None / scalar -> [a, 1-a] / per-class list.
    # alpha[target] is gathered once here (4 B/row) so the kernel skips one full
    # per-tile one-hot select + cross-class reduce.
    # NOTE: out-of-range targets are clipped by the gather (torch.gather would raise).
    alpha_vec = _alpha_vector(alpha)
    has_alpha = alpha_vec is not None
    at_row = jnp.take(alpha_vec, t_flat).astype(jnp.float32) if has_alpha else None

    in_bytes = jnp.dtype(inputs.dtype).itemsize
    # Working-set estimate per row/column of a tile: double-buffered input block
    # plus ~6 f32 temporaries over the (tile, C) block plus per-row scalars.
    workset_per_unit = 2 * C * in_bytes + 6 * C * 4 + 8 * 4

    if C <= _SMALL_C_MAX:
        # ---- rows-in-lanes layout: x is (C, N); 128 rows packed per vreg ----
        if inputs.ndim > 2:
            x2 = jnp.moveaxis(x3, 1, 0).reshape(C, N)   # column order = (batch, spatial)
        else:
            x2 = inputs.T
        t2 = t_flat.reshape(1, N)
        a2 = at_row.reshape(1, N) if has_alpha else None

        tile = max(128, (_TILE_WORKSET_BUDGET // workset_per_unit) // 128 * 128)
        tile = min(tile, 64 * 1024, _round_up(N, 128))
        if N > 128 and pl.cdiv(N, tile) < 2:            # >= 2 tiles -> both v7x TCs
            tile = max(128, _round_up(pl.cdiv(N, 2), 128))
        if tile >= N:
            tile = N                                    # full-extent block is always legal
        num_tiles = pl.cdiv(N, tile)
        need_mask = (N % tile) != 0

        kernel = _make_kernel_rows_in_lanes(float(gamma), C, tile, N,
                                            need_mask, has_alpha)
        in_specs = [pl.BlockSpec((C, tile), lambda i: (0, i)),
                    pl.BlockSpec((1, tile), lambda i: (0, i))]
        args = [x2, t2]
        if has_alpha:
            in_specs.append(pl.BlockSpec((1, tile), lambda i: (0, i)))
            args.append(a2)
    else:
        # ---- rows-in-sublanes layout: x is (N, C) ----
        if inputs.ndim > 2:
            x2 = jnp.moveaxis(x3, 1, 2).reshape(N, C)
        else:
            x2 = inputs
        t2 = t_flat.reshape(N, 1)
        a2 = at_row.reshape(N, 1) if has_alpha else None

        align = 16 if in_bytes == 2 else 8
        tile = max(align, (_TILE_WORKSET_BUDGET // workset_per_unit) // align * align)
        tile = min(tile, 4096, _round_up(N, align))
        if N > align and pl.cdiv(N, tile) < 2:          # >= 2 tiles for megacore
            tile = max(align, _round_up(pl.cdiv(N, 2), align))
        if tile >= N:
            tile = N
        num_tiles = pl.cdiv(N, tile)
        need_mask = (N % tile) != 0

        kernel = _make_kernel_rows_in_sublanes(float(gamma), C, tile, N,
                                               need_mask, has_alpha)
        in_specs = [pl.BlockSpec((tile, C), lambda i: (i, 0)),
                    pl.BlockSpec((tile, 1), lambda i: (i, 0))]
        args = [x2, t2]
        if has_alpha:
            in_specs.append(pl.BlockSpec((tile, 1), lambda i: (i, 0)))
            args.append(a2)

    partials = pl.pallas_call(
        kernel,
        out_shape=jax.ShapeDtypeStruct((num_tiles, 8, 128), jnp.float32),
        grid_spec=pl.GridSpec(
            grid=(num_tiles,),
            in_specs=in_specs,
            out_specs=pl.BlockSpec((1, 8, 128), lambda i: (i, 0, 0)),
        ),
        compiler_params=pltpu.CompilerParams(
            dimension_semantics=("parallel",),
            vmem_limit_bytes=_VMEM_LIMIT_BYTES,
        ),
    )(*args)

    total = jnp.sum(partials)           # num_tiles tiny blocks -- negligible traffic
    if size_average:
        return total * (1.0 / N)        # statically baked reciprocal
    return total


if __name__ == "__main__":
    key = jax.random.PRNGKey(0)
    k1, k2, k3, k4 = jax.random.split(key, 4)

    def ref_focal(x2d, tflat, gamma, alpha_vec, size_average):
        logp = jax.nn.log_softmax(x2d.astype(jnp.float32), axis=1)
        logpt = jnp.take_along_axis(logp, tflat[:, None], axis=1)[:, 0]
        pt = jnp.exp(logpt)
        if alpha_vec is not None:
            logpt = logpt * alpha_vec[tflat]
        l = -((1.0 - pt) ** gamma) * logpt
        return jnp.mean(l) if size_average else jnp.sum(l)

    # ---- Case 1: 4-D logits (batch, classes, H, W), per-class alpha, mean ----
    # Small C -> rows-in-lanes layout, 2 grid tiles.
    B, C, H, W = 2, 4, 16, 16
    logits = jax.random.normal(k1, (B, C, H, W), dtype=jnp.float32)
    target = jax.random.randint(k2, (B, H, W), 0, C, dtype=jnp.int32)
    gamma = 2.0
    alpha = [0.1, 0.2, 0.3, 0.4]

    loss = focal_loss(logits, target, gamma=gamma, alpha=alpha, size_average=True)
    jax.block_until_ready(loss)

    x2d = jnp.moveaxis(logits, 1, -1).reshape(-1, C)
    ref1 = ref_focal(x2d, target.reshape(-1), gamma,
                     jnp.asarray(alpha, jnp.float32), True)
    assert jnp.allclose(loss, ref1, rtol=1e-4, atol=1e-6), (loss, ref1)

    # ---- Case 2: 2-D logits, larger class count (rows-in-sublanes layout),
    #      no alpha, sum reduction, ragged N (exercises the in-kernel tile mask) ----
    N2, C2 = 100, 48
    logits2 = jax.random.normal(k3, (N2, C2), dtype=jnp.float32)
    target2 = jax.random.randint(k4, (N2,), 0, C2, dtype=jnp.int32)

    loss2 = focal_loss(logits2, target2, gamma=gamma, alpha=None, size_average=False)
    jax.block_until_ready(loss2)
    ref2 = ref_focal(logits2, target2, gamma, None, False)
    assert jnp.allclose(loss2, ref2, rtol=1e-4, atol=1e-5), (loss2, ref2)

    print("KERNEL_OK")
</pallas_src>

<mosaic_0001>
module attributes {stable_mosaic.version = 11 : i64} {
  func.func @kernel(%arg0: i32, %arg1: memref<4x256xf32, #tpu.memory_space<vmem>>, %arg2: memref<1x256xi32, #tpu.memory_space<vmem>>, %arg3: memref<1x256xf32, #tpu.memory_space<vmem>>, %arg4: memref<1x8x128xf32, #tpu.memory_space<vmem>>) attributes {dimension_semantics = [#tpu.dimension_semantics<parallel>], iteration_bounds = array<i64: 2>, scalar_prefetch = 0 : i64, scratch_operands = 0 : i64, tpu.core_type = #tpu.core_type<tc>, window_params = [{transform_indices = @transform_0, window_bounds = array<i64: 4, 256>}, {transform_indices = @transform_1, window_bounds = array<i64: 1, 256>}, {transform_indices = @transform_2, window_bounds = array<i64: 1, 256>}, {transform_indices = @transform_3, window_bounds = array<i64: 1, 8, 128>}]} {
    %c0 = arith.constant 0 : index
    %c0_0 = arith.constant 0 : index
    %0 = vector.load %arg1[%c0, %c0_0] : memref<4x256xf32, #tpu.memory_space<vmem>>, vector<4x256xf32>
    %c0_1 = arith.constant 0 : index
    %c0_2 = arith.constant 0 : index
    %1 = vector.load %arg2[%c0_1, %c0_2] : memref<1x256xi32, #tpu.memory_space<vmem>>, vector<1x256xi32>
    %2 = tpu.iota {dimensions = array<i32: 0>} : vector<4x256xi32>
    %3 = vector.broadcast %1 : vector<1x256xi32> to vector<4x256xi32>
    %4 = arith.cmpi eq, %2, %3 : vector<4x256xi32>
    %cst = arith.constant dense<0xFF800000> : vector<256xf32>
    %5 = vector.multi_reduction <maximumf>, %0, %cst [0] : vector<4x256xf32> to vector<256xf32>
    %6 = vector.shape_cast %5 : vector<256xf32> to vector<1x256xf32>
    %7 = vector.broadcast %6 : vector<1x256xf32> to vector<4x256xf32>
    %8 = arith.subf %0, %7 : vector<4x256xf32>
    %9 = math.exp %8 : vector<4x256xf32>
    %cst_3 = arith.constant dense<0.000000e+00> : vector<256xf32>
    %10 = vector.multi_reduction <add>, %9, %cst_3 [0] : vector<4x256xf32> to vector<256xf32>
    %11 = vector.shape_cast %10 : vector<256xf32> to vector<1x256xf32>
    %12 = math.log %11 : vector<1x256xf32>
    %13 = arith.addf %6, %12 : vector<1x256xf32>
    %cst_4 = arith.constant 0.000000e+00 : f32
    %14 = vector.broadcast %cst_4 : f32 to vector<4x256xf32>
    %15 = arith.select %4, %0, %14 : vector<4x256xi1>, vector<4x256xf32>
    %cst_5 = arith.constant dense<0.000000e+00> : vector<256xf32>
    %16 = vector.multi_reduction <add>, %15, %cst_5 [0] : vector<4x256xf32> to vector<256xf32>
    %17 = vector.shape_cast %16 : vector<256xf32> to vector<1x256xf32>
    %18 = arith.subf %17, %13 : vector<1x256xf32>
    %19 = math.exp %18 : vector<1x256xf32>
    %c0_6 = arith.constant 0 : index
    %c0_7 = arith.constant 0 : index
    %20 = vector.load %arg3[%c0_6, %c0_7] : memref<1x256xf32, #tpu.memory_space<vmem>>, vector<1x256xf32>
    %21 = arith.mulf %18, %20 : vector<1x256xf32>
    %cst_8 = arith.constant 1.000000e+00 : f32
    %22 = vector.broadcast %cst_8 : f32 to vector<1x256xf32>
    %23 = arith.subf %22, %19 : vector<1x256xf32>
    %cst_9 = arith.constant 1.000000e+00 : f32
    %24 = vector.broadcast %cst_9 : f32 to vector<1x256xf32>
    %25 = arith.mulf %24, %23 : vector<1x256xf32>
    %26 = arith.mulf %25, %23 : vector<1x256xf32>
    %cst_10 = arith.constant 0.000000e+00 : f32
    %27 = vector.broadcast %cst_10 : f32 to vector<1x256xf32>
    %28 = arith.subf %27, %26 : vector<1x256xf32>
    %29 = arith.mulf %28, %21 : vector<1x256xf32>
    %cst_11 = arith.constant dense<0.000000e+00> : vector<1xf32>
    %30 = vector.multi_reduction <add>, %29, %cst_11 [1] : vector<1x256xf32> to vector<1xf32>
    %31 = vector.shape_cast %30 : vector<1xf32> to vector<1x1xf32>
    %32 = tpu.iota {dimensions = array<i32: 0>} : vector<8x128xi32>
    %33 = tpu.iota {dimensions = array<i32: 1>} : vector<8x128xi32>
    %c0_i32 = arith.constant 0 : i32
    %34 = vector.broadcast %c0_i32 : i32 to vector<8x128xi32>
    %35 = arith.cmpi eq, %32, %34 : vector<8x128xi32>
    %c0_i32_12 = arith.constant 0 : i32
    %36 = vector.broadcast %c0_i32_12 : i32 to vector<8x128xi32>
    %37 = arith.cmpi eq, %33, %36 : vector<8x128xi32>
    %38 = arith.andi %35, %37 : vector<8x128xi1>
    %cst_13 = arith.constant 0.000000e+00 : f32
    %39 = vector.shape_cast %31 : vector<1x1xf32> to vector<1x1xf32>
    %40 = vector.broadcast %39 : vector<1x1xf32> to vector<8x128xf32>
    %41 = vector.broadcast %cst_13 : f32 to vector<8x128xf32>
    %42 = arith.select %38, %40, %41 : vector<8x128xi1>, vector<8x128xf32>
    %43 = vector.shape_cast %42 : vector<8x128xf32> to vector<1x8x128xf32>
    %c0_14 = arith.constant 0 : index
    %c0_15 = arith.constant 0 : index
    %c0_16 = arith.constant 0 : index
    %44 = vector.load %arg4[%c0_14, %c0_15, %c0_16] : memref<1x8x128xf32, #tpu.memory_space<vmem>>, vector<1x8x128xf32>
    tpu.vector_store %arg4[%c0_14, %c0_15, %c0_16], %43 {strides = array<i32>} : memref<1x8x128xf32, #tpu.memory_space<vmem>>, vector<1x8x128xf32>,
    return
  }
  func.func @transform_0(%arg0: i32) -> (i32, i32) {
    %c0_i32 = arith.constant 0 : i32
    %c0_i32_0 = arith.constant 0 : i32
    return %c0_i32, %arg0 : i32, i32
  }
  func.func @transform_1(%arg0: i32) -> (i32, i32) {
    %c0_i32 = arith.constant 0 : i32
    %c0_i32_0 = arith.constant 0 : i32
    return %c0_i32, %arg0 : i32, i32
  }
  func.func @transform_2(%arg0: i32) -> (i32, i32) {
    %c0_i32 = arith.constant 0 : i32
    %c0_i32_0 = arith.constant 0 : i32
    return %c0_i32, %arg0 : i32, i32
  }
  func.func @transform_3(%arg0: i32) -> (i32, i32, i32) {
    %c0_i32 = arith.constant 0 : i32
    %c0_i32_0 = arith.constant 0 : i32
    %c0_i32_1 = arith.constant 0 : i32
    return %arg0, %c0_i32, %c0_i32_0 : i32, i32, i32
  }
}

</mosaic_0001>

<bundles_post_ra>
// kernel: tpu_custom_call.1
= control target key start
LH: loop header
LB: loop body
LE: loop exit
PB: predicated region body
PF: predicated region fallthrough
CT: control target
= control target key end

     0   :  { %s981_s0 = inlined_call_operand.hbm [shape: f32[4,512], index: 0, kind: input, shape index: {}]   ;;  %s982_s1 = inlined_call_operand.hbm [shape: s32[1,512], index: 1, kind: input, shape index: {}]   ;;  %s983_s2 = inlined_call_operand.hbm [shape: f32[1,512], index: 2, kind: input, shape index: {}]   ;;  %s984_s3 = inlined_call_operand.hbm [shape: f32[2,8,128], index: 3, kind: output, shape index: {}]  }
   0x1   :  { %986 = sst [smem:[#allocation13_spill]] %s982_s1 }
   0x2   :  { %8 = vsyncpa [#allocation3], 0 }
   0x3   :  { %10 = vsyncpa [#allocation3 + $0x1], 0 }
   0x4   :  { %11 = vsyncpa [#allocation6], 0 }
   0x5   :  { %13 = vsyncpa [#allocation6 + $0x1], 0 }
   0x6   :  { %14 = vsyncpa [#allocation4], 0 }
   0x7   :  { %16 = vsyncpa [#allocation4 + $0x1], 0  ;;  %s784_s12 = smov 0   ;;  %s786_s13 = smov 0  }
   0x8   :  { %s788_s14 = smov 0   ;;  %s790_s15 = smov 0  }
   0x9 LB: > { %s805_s16 = sadd.s32 4294967295, %s762_s15   ;;  %s516_s17 = sadd.s32 4294967294, %s762_s15   ;;  %s762_s15 = sphi %s790_s15, %s999_s15   ;;  %s758_s14 = sphi %s788_s14, %s998_s14   ;;  %s754_s13 = sphi %s786_s13, %s997_s13   ;;  %s750_s12 = sphi %s784_s12, %s996_s12  }
   0xa   : > { %s809_s18 = sadd.s32 1, %s762_s15   ;;  %s29_s19 = sadd.s32 1, %s758_s14 }
   0xb   : > { %s26_s20 = ssub.s32 %s762_s15, %s809_s18  ;;  %p36_p0 = scmp.ne.s32.totalorder %s758_s14, %s754_s13 }
   0xc   : > { %p27_p1 = scmp.eq.s32.totalorder %s26_s20, 0  ;;  %p37_p2 = scmp.eq.s32.totalorder %s762_s15, 0 }
   0xd   : > { %p42_p3 = scmp.ne.s32.totalorder %s754_s13, %s750_s12  ;;  %p43_p4 = scmp.eq.s32.totalorder %s805_s16, 0 }
   0xe   : > { %s821_s21 = scalar_select %p27_p1, %s758_s14, %s29_s19  }
   0xf   : > { %p38_p5 = por %p37_p2, %p36_p0  ;;  %p823_p6 = por %p43_p4, %p42_p3 }
  0x10   : > { %987 = sst [smem:[#allocation12_spill]] %s821_s21  ;;  %p118_p7 = scmp.eq.s32.totalorder %s805_s16, 1 }
  0x11   : > { %p124_p8 = scmp.eq.s32.totalorder %s516_s17, 1  ;;  %p518_p9 = scmp.ge.s32.totalorder %s762_s15, 2 }
  0x12   : > { %p558_p10 = scmp.lt.s32.totalorder %s762_s15, 2  ;;  %p830_p11 = por %p118_p7, %p36_p0 }
  0x13   : > { %p834_p12 = por %p124_p8, %p42_p3  ;;  %s839_s25 = sand.u32 1, %s758_s14  }
  0x14   : > { %p841_p13 = pnand %p558_p10, %p38_p5  ;;  %s164_s27 = sand.u32 1, %s762_s15  }
  0x15   : > { %s985_s28 = sshll.u32 %s839_s25, 1  ;;  %s523_s29 = sshll.u32 %s762_s15, 1 }
  0x16   : > { %s992_s1 = sld [smem:[#allocation13_spill]]  ;;  %s168_s6 = scalar_lea.vmem [#allocation5], %s985_s28 }
  0x17   : > { %s176_s7 = sshll.u32 %s168_s6, 4  ;;  %s853_s9 = scalar_lea.sflag [#allocation6], %s164_s27  ;;  %s177_s7 = int_to_ptr.vmem [resolvable:$true] %s176_s7 }
  0x18   : > { %p606_p1 = pneg %p841_p13 }
  0x1c   : > { %s172_s5 = scalar_lea.hbm %s992_s1, %s523_s29  ;;  %s609_s20 = scalar_lea.hbm %s992_s1, 4 }
  0x1d   : > { %s174_s8 = sshll.u32 %s172_s5, 4  ;;  %s175_s8 = int_to_ptr.hbm [resolvable:$true] %s174_s8 }
  0x1e   : > { %s602_s10 = sshra.s32 %s175_s8, 4  ;;  %s603_s10 = int_to_ptr.hbm [resolvable:$true] %s602_s10 }
  0x1f   : > { %s604_s11 = scalar_lea.hbm %s603_s10, 2  ;;  %p610_p4 = scmp.lt.s32.totalorder %s603_s10, %s992_s1 }
  0x20   : > { %p605_p0 = scmp.ne.s32.totalorder %s603_s10, %s604_s11  ;;  %p611_p5 = scmp.lt.s32.totalorder %s609_s20, %s604_s11 }
  0x22   : > { %p607_p2 = pnand %p606_p1, %p605_p0  ;;  %p612_p7 = por %p611_p5, %p610_p4 }
  0x24   : > { %p608_p3 = pneg %p607_p2 }
  0x26   : > { %p613_p8 = pnand %p612_p7, %p608_p3 }
  0x28   : > { %616 = shalt.err (!%p613_p8)
}
  0x29   : > { %550 = dma.hbm_to_vmem [thread:$0]  (!%p841_p13), %s175_s8, 32, %s177_s7, %s853_s9  }
  0x2a   : > { %s191_s6 = scalar_lea.hbm %s983_s2, %s523_s29  ;;  %p526_p10 = scmp.ge.s32.totalorder %s762_s15, 1 }
  0x2b   : > { %p200_p0 = scmp.lt.s32.totalorder %s762_s15, 3  ;;  %s519_s10 = sshll.u32 %s839_s25, 3 }
  0x2c   : > { %s535_s11 = sshll.u32 %s762_s15, 3  ;;  %s148_s4 = scalar_lea.vmem [#allocation2], %s519_s10 }
  0x2d   : > { %p876_p2 = pnand %p526_p10, %p200_p0  ;;  %s153_s30 = scalar_lea.hbm %s981_s0, %s535_s11 }
  0x2e   : > { %s157_s28 = sshll.u32 %s148_s4, 4  ;;  %s155_s7 = sshll.u32 %s153_s30, 4  ;;  %s158_s28 = int_to_ptr.vmem [resolvable:$true] %s157_s28  ;;  %s156_s7 = int_to_ptr.hbm [resolvable:$true] %s155_s7 }
  0x2f   : > { %s193_s8 = sshll.u32 %s191_s6, 4  ;;  %s145_s29 = scalar_lea.sflag [#allocation3], %s839_s25  ;;  %s194_s8 = int_to_ptr.hbm [resolvable:$true] %s193_s8 }
  0x30   : > { %s632_s27 = sshra.s32 %s156_s7, 4  ;;  %s639_s19 = scalar_lea.hbm %s981_s0, 16  ;;  %s633_s27 = int_to_ptr.hbm [resolvable:$true] %s632_s27 }
  0x31   : > { %s634_s5 = scalar_lea.hbm %s633_s27, 8  ;;  %p640_p7 = scmp.lt.s32.totalorder %s633_s27, %s981_s0 }
  0x32   : > { %p635_p3 = scmp.ne.s32.totalorder %s633_s27, %s634_s5  ;;  %p641_p8 = scmp.lt.s32.totalorder %s639_s19, %s634_s5 }
  0x34   : > { %p637_p4 = pnand %p635_p3, %p606_p1  ;;  %p642_p10 = por %p641_p8, %p640_p7 }
  0x36   : > { %p638_p5 = pneg %p637_p4 }
  0x38   : > { %p643_p0 = pnand %p642_p10, %p638_p5 }
  0x3a   : > { %646 = shalt.err (!%p643_p0)
}
  0x3b   : > { %547 = dma.hbm_to_vmem [thread:$0]  (!%p841_p13), %s156_s7, 128, %s158_s28, %s145_s29  }
  0x3c   : > { %s994_s6 = sshll.u32 %s839_s25, 1  ;;  %s662_s1 = sshra.s32 %s194_s8, 4  ;;  %s663_s1 = int_to_ptr.hbm [resolvable:$true] %s662_s1 }
  0x3d   : > { %s187_s20 = scalar_lea.vmem [#allocation7], %s994_s6  ;;  %s664_s21 = scalar_lea.hbm %s663_s1, 2 }
  0x3e   : > { %s195_s30 = sshll.u32 %s187_s20, 4  ;;  %p665_p3 = scmp.ne.s32.totalorder %s663_s1, %s664_s21  ;;  %s196_s30 = int_to_ptr.vmem [resolvable:$true] %s195_s30 }
  0x3f   : > { %s669_s5 = scalar_lea.hbm %s983_s2, 4  ;;  %p670_p5 = scmp.lt.s32.totalorder %s663_s1, %s983_s2 }
  0x40   : > { %p667_p4 = pnand %p665_p3, %p606_p1  ;;  %p671_p8 = scmp.lt.s32.totalorder %s669_s5, %s664_s21 }
  0x42   : > { %p668_p7 = pneg %p667_p4  ;;  %p672_p10 = por %p671_p8, %p670_p5 }
  0x44   : > { %p673_p0 = pnand %p672_p10, %p668_p7 }
  0x46   : > { %676 = shalt.err (!%p673_p0)
}
  0x47   : > { %553 = dma.hbm_to_vmem [thread:$0]  (!%p841_p13), %s194_s8, 32, %s196_s30, %s853_s9  }
  0x48   : > { %204 = sbr.rel (%p876_p2) target bundleno = 294 (0x126), region = 32  ;;  %s912_s25 = sand.u32 (!%p876_p2), 1, %s754_s13  }
  0x49   : > { %s527_s28 = sshll.u32 (!%p876_p2), %s912_s25, 3  ;;  %s207_s7 = scalar_lea.sflag (!%p876_p2), [#allocation3], %s912_s25 }
  0x4a   : > { %s210_s29 = scalar_lea.vmem (!%p876_p2), [#allocation2], %s527_s28 }
  0x4d   : > { %737 = dma.done.wait (%p823_p6), %s207_s7, 128  }
  0x4e   : > { %739 = vsyncadd (%p823_p6), %s207_s7, 4294967168  ;;  %s216_s26 = sand.u32 1, %s805_s16   ;;  %s528_s9 = sshll.u32 %s912_s25, 1 }
  0x4f   : > { %s217_s17 = scalar_lea.sflag [#allocation6], %s216_s26  ;;  %s220_s8 = scalar_lea.vmem [#allocation5], %s528_s9 }
  0x50   : > { %741 = dma.done.wait (%p823_p6), %s217_s17, 64  }
  0x51   : > { %743 = vsyncadd (%p823_p6), %s217_s17, 4294967232  ;;  %v267_v0 = vld [vmem:[%s210_s29] sm:$0xff]  ;;  %vm281_vm0 = vcmask 1043456   ;;  %v269_v22 = vlaneseq  ;;  %v268_v23 = vld [vmem:[%s220_s8] sm:$0x3]  ;;  %s230_s22 = scalar_lea.vmem [#allocation7], %s528_s9 }
  0x52   : > { %276 = vst [vmem:[#allocation1] ss:$2 sm:$0xff] %v267_v0  ;;  %v271_v29 = vperm.slane %v268_v23, 0  ;;  %v272_v30 = vperm.slane %v268_v23, 1  ;;  %vm373_vm3 = vcmask 1040384   ;;  %s532_s10 = sshll.u32 %s805_s16, 3 }
  0x53   : > { %v934_v26 = vshrl.u32 %v269_v22, 7  ;;  %s398_s30 = scalar_lea.hbm %s984_s3, %s532_s10  ;;  %s263_s1 = scalar_lea.vmem [#allocation8], %s527_s28 }
  0x54   : > { %s400_s21 = sshll.u32 %s263_s1, 4  ;;  %s402_s4 = sshll.u32 %s398_s30, 4  ;;  %s401_s21 = int_to_ptr.vmem [resolvable:$true] %s400_s21  ;;  %s403_s4 = int_to_ptr.hbm [resolvable:$true] %s402_s4 }
  0x55   : > { %vm273_vm1 = vcmp.eq.s32.totalorder %v934_v26, %v271_v29  ;;  %vm274_vm2 = vcmp.eq.s32.totalorder %v934_v26, %v272_v30  ;;  %vm381_vm4 = vcmp.eq.s32.totalorder %v934_v26, 0  ;;  %s388_s16 = scalar_lea.sflag [#allocation4], %s912_s25  ;;  %s706_s27 = sshra.s32 %s403_s4, 4  ;;  %s707_s27 = int_to_ptr.hbm [resolvable:$true] %s706_s27 }
  0x56   : > { %s708_s5 = scalar_lea.hbm %s707_s27, 8  ;;  %s712_s28 = scalar_lea.hbm %s984_s3, 16 }
  0x57   : > { %p709_p6 = scmp.ne.s32.totalorder %s707_s27, %s708_s5  ;;  %p713_p2 = scmp.lt.s32.totalorder %s707_s27, %s984_s3 }
  0x58   : > { %p714_p3 = scmp.lt.s32.totalorder %s712_s28, %s708_s5 }
  0x59   : > { %v277_v1 = vld.sshfl [vmem:[#allocation1] sm:$0xff pattern:$0x75316420]  ;;  %v278_v2 = vld.sshfl [vmem:[#allocation1 + $0x8] sm:$0xff pattern:$0x75316420]  ;;  %p710_p13 = pnand %p709_p6, %p830_p11 }
  0x5a   : > { %v282_v3 = vsel %vm281_vm0, %v277_v1, -inf  ;;  %v289_v4 = vsel %vm281_vm0, %v278_v2, -inf  ;;  %p715_p4 = por %p714_p3, %p713_p2 }
  0x5b   : > { %v283_v5 = vrot.slane %v282_v3, 4  ;;  %v290_v6 = vrot.slane %v289_v4, 4  ;;  %p711_p1 = pneg %p710_p13 }
  0x5d   : > { %v284_v7 = vmax.f32 %v282_v3, %v283_v5  ;;  %v291_v8 = vmax.f32 %v289_v4, %v290_v6  ;;  %p716_p7 = pnand %p715_p4, %p711_p1 }
  0x5f   : > { %v285_v9 = vrot.slane %v284_v7, 2  ;;  %v292_v10 = vrot.slane %v291_v8, 2 }
  0x61   : > { %v286_v11 = vmax.f32 %v284_v7, %v285_v9  ;;  %v293_v12 = vmax.f32 %v291_v8, %v292_v10  ;;  %v357_v7 = vld [vmem:[%s230_s22] sm:$0x3] }
  0x62   : > { %v359_v8 = vperm.slane %v357_v7, 0  ;;  %v360_v10 = vperm.slane %v357_v7, 1 }
  0x63   : > { %v287_v13 = vrot.slane %v286_v11, 1  ;;  %v294_v14 = vrot.slane %v293_v12, 1 }
  0x65   : > { %v288_v15 = vmax.f32 %v286_v11, %v287_v13  ;;  %v295_v16 = vmax.f32 %v293_v12, %v294_v14 }
  0x67   : > { %v298_v17 = vrot.slane %v295_v16, 4 }
  0x69   : > { %v299_v18 = vsel %vm281_vm0, %v288_v15, %v298_v17 }
  0x6a   : > { %v301_v19 = vsub.f32 %v267_v0, %v299_v18 }
  0x6c   : > { %v302_v20 = vmul.f32 1.442695, %v301_v19 }
  0x6e   : > { %592 = vpow2.f32 %v302_v20 }
  0x74   : > { %v593_v21 = vpop.eup %592 }
  0x75   : > { %305 = vst [vmem:[#allocation1] ss:$2 sm:$0xff] %v593_v21 }
  0x7c   : > { %v306_v24 = vld.sshfl [vmem:[#allocation1] sm:$0xff pattern:$0x75316420]  ;;  %v307_v25 = vld.sshfl [vmem:[#allocation1 + $0x8] sm:$0xff pattern:$0x75316420] }
  0x7d   : > { %v310_v27 = vsel %vm281_vm0, %v306_v24, 0.0  ;;  %v317_v28 = vsel %vm281_vm0, %v307_v25, 0.0  ;;  %330 = vst [vmem:[#allocation1] ss:$2 sm:$0xff] %v267_v0 }
  0x7e   : > { %v311_v31 = vrot.slane %v310_v27, 4  ;;  %v318_v32 = vrot.slane %v317_v28, 4 }
  0x80   : > { %v312_v33 = vadd.f32 %v311_v31, %v310_v27  ;;  %v319_v34 = vadd.f32 %v318_v32, %v317_v28  ;;  %v380_v27 = vand.u32 127, %v269_v22 }
  0x82   : > { %v313_v35 = vrot.slane %v312_v33, 2  ;;  %v320_v36 = vrot.slane %v319_v34, 2  ;;  %vm382_vm5 = vcmp.eq.s32.totalorder %v380_v27, 0 }
  0x83   : > { %vm383_vm6 = vmand %vm381_vm4, %vm382_vm5 }
  0x84   : > { %v314_v37 = vadd.f32 %v313_v35, %v312_v33  ;;  %v321_v38 = vadd.f32 %v320_v36, %v319_v34  ;;  %v331_v39 = vld.sshfl [vmem:[#allocation1] sm:$0xff pattern:$0x75316420]  ;;  %v332_v40 = vld.sshfl [vmem:[#allocation1 + $0x8] sm:$0xff pattern:$0x75316420] }
  0x85   : > { %v335_v41 = vsel %vm273_vm1, %v331_v39, 0.0  ;;  %v336_v42 = vsel %vm274_vm2, %v332_v40, 0.0 }
  0x86   : > { %v315_v43 = vrot.slane %v314_v37, 1  ;;  %v322_v44 = vrot.slane %v321_v38, 1  ;;  %v337_v45 = vsel %vm281_vm0, %v335_v41, 0.0  ;;  %v344_v46 = vsel %vm281_vm0, %v336_v42, 0.0 }
  0x87   : > { %v338_v47 = vrot.slane %v337_v45, 4  ;;  %v345_v48 = vrot.slane %v344_v46, 4 }
  0x88   : > { %v316_v49 = vadd.f32 %v315_v43, %v314_v37  ;;  %v323_v50 = vadd.f32 %v322_v44, %v321_v38 }
  0x89   : > { %v339_v51 = vadd.f32 %v338_v47, %v337_v45  ;;  %v346_v52 = vadd.f32 %v345_v48, %v344_v46 }
  0x8a   : > { %594 = vlog2.f32 %v316_v49 }
  0x8b   : > { %596 = vlog2.f32 %v323_v50  ;;  %v340_v53 = vrot.slane %v339_v51, 2  ;;  %v347_v54 = vrot.slane %v346_v52, 2 }
  0x8d   : > { %v341_v55 = vadd.f32 %v340_v53, %v339_v51  ;;  %v348_v56 = vadd.f32 %v347_v54, %v346_v52 }
  0x8f   : > { %v342_v57 = vrot.slane %v341_v55, 1  ;;  %v349_v58 = vrot.slane %v348_v56, 1 }
  0x90   : > { %v595_v59 = vpop.eup %594 }
  0x91   : > { %v597_v60 = vpop.eup %596  ;;  %v325_v61 = vmul.f32 0.6931472, %v595_v59  ;;  %v343_v62 = vadd.f32 %v342_v57, %v341_v55  ;;  %v350_v0 = vadd.f32 %v349_v58, %v348_v56 }
  0x92   : > { %v327_v63 = vmul.f32 0.6931472, %v597_v60 }
  0x93   : > { %v328_v1 = vadd.f32 %v325_v61, %v288_v15 }
  0x94   : > { %v329_v2 = vadd.f32 %v327_v63, %v295_v16 }
  0x95   : > { %v351_v3 = vsub.f32 %v343_v62, %v328_v1 }
  0x96   : > { %v352_v4 = vsub.f32 %v350_v0, %v329_v2 }
  0x97   : > { %v353_v5 = vmul.f32 1.442695, %v351_v3  ;;  %v363_v14 = vmul.f32 %v359_v8, %v351_v3 }
  0x98   : > { %v355_v6 = vmul.f32 1.442695, %v352_v4  ;;  %v364_v15 = vmul.f32 %v360_v10, %v352_v4 }
  0x99   : > { %598 = vpow2.f32 %v353_v5 }
  0x9a   : > { %600 = vpow2.f32 %v355_v6 }
  0x9f   : > { %v599_v9 = vpop.eup %598 }
  0xa0   : > { %v601_v11 = vpop.eup %600  ;;  %v365_v12 = vsub.f32 1.0, %v599_v9 }
  0xa1   : > { %v366_v13 = vsub.f32 1.0, %v601_v11 }
  0xa2   : > { %v367_v17 = vmul.f32 %v365_v12, %v365_v12 }
  0xa3   : > { %v368_v16 = vmul.f32 %v366_v13, %v366_v13 }
  0xa4   : > { %v369_v18 = vsub.f32 0.0, %v367_v17 }
  0xa5   : > { %v370_v19 = vsub.f32 0.0, %v368_v16 }
  0xa6   : > { %v371_v20 = vmul.f32 %v369_v18, %v363_v14 }
  0xa7   : > { %v372_v21 = vmul.f32 %v370_v19, %v364_v15 }
  0xa8   : > { %v374_v23 = vsel %vm373_vm3, %v371_v20, 0.0 }
  0xa9   : > { %v375_v24 = vsel %vm373_vm3, %v372_v21, 0.0 }
  0xaa   : > { %v376_v25 = vadd.f32 %v375_v24, %v374_v23 }
  0xac   : > { %377 = vadd.xlane.f32.xlu0 %v376_v25 }
 0x11f   : > { %v378_v28 = vpop.xlane.xlu0 %377 }
 0x120   : > { %v384_v29 = vperm.slane %v378_v28, 0 }
 0x122   : > { %v385_v30 = vsel %vm383_vm6, %v384_v29, 0.0 }
 0x123   : > { %386 = vst [vmem:[%s263_s1] sm:$0xff] %v385_v30 }
 0x124   : > { %719 = shalt.err (!%p716_p7)
}
 0x125   : > { %542 = dma.vmem_to_hbm [thread:$0]  (%p830_p11), %s401_s21, 128, %s403_s4, %s388_s16  }
 0x126 PF: > { %s414_s25 = sand.u32 1, %s750_s12   ;;  %p555_p5 = pnand %p518_p9, %p834_p12 }
 0x127   : > { %s415_s26 = scalar_lea.sflag [#allocation4], %s414_s25 }
 0x128   : > { %p556_p8 = pneg %p555_p5 }
 0x12a   : > { %745 = dma.done.wait (%p556_p8), %s415_s26, 128  }
 0x12b   : > { %747 = vsyncadd (%p556_p8), %s415_s26, 4294967168  ;;  %s995_s9 = sld [smem:[#allocation12_spill]]  ;;  %p19_p10 = scmp.ge.s32.totalorder %s809_s18, 4  }
 0x12c   : > { %s996_s12 = smov %s754_s13  ;;  %s997_s13 = smov %s758_s14 }
 0x12d   : > { %s999_s15 = smov %s809_s18  ;;  %21 = sbr.rel (!%p19_p10) target bundleno = 9 (0x9), region = 101 }
 0x131   : > { %s998_s14 = smov %s995_s9 }
 0x132   :  { %421 = vsyncpa [#allocation3], 1 }
 0x133   :  { %423 = vsyncpa [#allocation3 + $0x1], 1 }
 0x134   :  { %424 = vsyncpa [#allocation6], 1 }
 0x135   :  { %426 = vsyncpa [#allocation6 + $0x1], 1 }
 0x136   :  { %427 = vsyncpa [#allocation4], 1 }
 0x137   :  { %429 = vsyncpa [#allocation4 + $0x1], 1 }

</bundles_post_ra>
